<compile_context>
chip_gen: v5e
topology: v5e:2x2
jax: 0.10.0
libtpu: 0.0.40
codegen_flags: <defaults>
</compile_context>

<pallas_src>
import math

import jax
import jax.numpy as jnp
from jax.experimental import pallas as pl
from jax.experimental.pallas import tpu as pltpu


def box_head_kernel(x_ref, bn_ref, w1_ref, b1_ref, w2345_ref, b2345_ref,
                    w6t_ref, b6_ref, out_ref):
    bn = bn_ref[...]                       # (tm, 4) f32: [s1 | t1 | s2 | t2]
    s1, t1 = bn[:, 0:1], bn[:, 1:2]
    s2, t2 = bn[:, 2:3], bn[:, 3:4]

    # fc1: (tm, F) @ (F, 32) -> (tm, 32), bf16 MXU matmul, f32 accumulation.
    h = jnp.dot(x_ref[...], w1_ref[...],
                preferred_element_type=jnp.float32) + b1_ref[...]
    h = s1 * h + t1                        # ln1: eval-mode BN, row-wise affine

    # fused fc2·fc3·fc4·fc5: (tm, 32) @ (32, 7) -> (tm, 7)
    h = jnp.dot(h.astype(jnp.bfloat16), w2345_ref[...],
                preferred_element_type=jnp.float32) + b2345_ref[...]
    h = s2 * h + t2                        # ln2: eval-mode BN, row-wise affine

    # fc6 computed transposed for a lane-dense (7, tm) store:
    #   out^T = W6^T @ h^T + b6   -> (7, tm)
    h_t = jnp.transpose(h).astype(jnp.bfloat16)          # (7, tm)
    out_ref[...] = jnp.dot(w6t_ref[...], h_t,
                           preferred_element_type=jnp.float32) + b6_ref[...]


def _round_up(x, m):
    return (x + m - 1) // m * m


def _lcm(a, b):
    return a * b // math.gcd(a, b)


def box_head_forward(x, params, *, block_m=2048):
    """x: (B, in_ins, in_feat) float32.  Returns (B, in_ins, 7) float32."""
    (w1, b1, s1, t1, w2, b2, w3, b3, w4, b4, w5, b5, s2, t2, w6, b6) = params
    B, I, F = x.shape
    M = B * I

    # ---- Exact f32 fold of the affine-only chain fc2 -> fc3 -> fc4 -> fc5.
    w2345 = w2 @ w3 @ w4 @ w5                            # (32, 7)
    b2345 = ((b2 @ w3 + b3) @ w4 + b4) @ w5 + b5         # (7,)

    # ---- Row-tile selection.
    #  * tm % in_ins == 0  -> per-tile packed BN constant is valid.
    #  * tm % 16 == 0      -> bf16 sublane packing.
    #  * multi-tile case additionally needs tm % 128 == 0 so the transposed
    #    (7, tm) output block is lane-dense; a single tile equal to the full
    #    array satisfies the block constraint for any tm (and keeps Mp == M
    #    when possible, avoiding a pad-then-slice pass).
    unit = _lcm(I, 16)
    big = _lcm(unit, 128)
    if M <= big:
        tm = _round_up(M, unit)
        Mp = tm
    else:
        tm = max(big, (min(block_m, M) // big) * big)
        Mp = _round_up(M, tm)
    grid = Mp // tm

    # Flattened rows: row r = b*in_ins + i uses BN channel i = r % in_ins.
    x2 = jnp.reshape(x, (M, F)).astype(jnp.bfloat16)
    if Mp > M:
        x2 = jnp.pad(x2, ((0, Mp - M), (0, 0)))

    # ---- Packed per-tile BN constant (tm, 4) = [s1 | t1 | s2 | t2].
    reps = tm // I

    def col(v):
        return jnp.tile(v.astype(jnp.float32), reps).reshape(tm, 1)

    bn = jnp.concatenate([col(s1), col(t1), col(s2), col(t2)], axis=1)

    w1b = w1.astype(jnp.bfloat16)                        # (F, 32)
    b1r = b1.reshape(1, -1).astype(jnp.float32)          # (1, 32)
    w2345b = w2345.astype(jnp.bfloat16)                  # (32, 7)
    b2345r = b2345.reshape(1, -1).astype(jnp.float32)    # (1, 7)
    w6t = jnp.transpose(w6).astype(jnp.bfloat16)         # (7, 7)  W6^T
    b6c = b6.reshape(-1, 1).astype(jnp.float32)          # (7, 1)

    def const_spec(p):
        return pl.BlockSpec(p.shape, lambda m: (0,) * p.ndim)

    out_t = pl.pallas_call(
        box_head_kernel,
        out_shape=jax.ShapeDtypeStruct((7, Mp), jnp.float32),
        grid=(grid,),
        in_specs=[pl.BlockSpec((tm, F), lambda m: (m, 0)),
                  const_spec(bn), const_spec(w1b), const_spec(b1r),
                  const_spec(w2345b), const_spec(b2345r),
                  const_spec(w6t), const_spec(b6c)],
        out_specs=pl.BlockSpec((7, tm), lambda m: (0, m)),
        compiler_params=pltpu.CompilerParams(
            dimension_semantics=("parallel",)),
    )(x2, bn, w1b, b1r, w2345b, b2345r, w6t, b6c)

    if Mp > M:
        out_t = out_t[:, :M]
    return jnp.transpose(out_t).reshape(B, I, 7)


def _bn_affine(key, n, eps=1e-5):
    """Eval-mode BatchNorm1d(n) folded to per-channel scale/shift."""
    kg, kb, km, kv = jax.random.split(key, 4)
    gamma = 1.0 + 0.1 * jax.random.normal(kg, (n,), jnp.float32)
    beta = 0.1 * jax.random.normal(kb, (n,), jnp.float32)
    mean = 0.05 * jax.random.normal(km, (n,), jnp.float32)
    var = 1.0 + 0.1 * jax.random.uniform(kv, (n,), jnp.float32)
    s = gamma / jnp.sqrt(var + eps)
    t = beta - mean * s
    return s, t


def make_params(key, in_feat, in_ins):
    """Deterministic synthetic parameters matching BoxHead.__init__ shapes.

    Linear weights are stored as (in, out) (transposed from PyTorch)."""
    dims = [(in_feat, 32), (32, 32), (32, 64), (64, 32), (32, 7), (7, 7)]
    keys = jax.random.split(key, 2 * len(dims) + 2)
    lin = []
    for i, (cin, cout) in enumerate(dims):
        W = 0.1 * jax.random.normal(keys[2 * i], (cin, cout), jnp.float32)
        b = 0.05 * jax.random.normal(keys[2 * i + 1], (cout,), jnp.float32)
        lin.append((W, b))
    s1, t1 = _bn_affine(keys[-2], in_ins)
    s2, t2 = _bn_affine(keys[-1], in_ins)
    (w1, b1), (w2, b2), (w3, b3), (w4, b4), (w5, b5), (w6, b6) = lin
    return (w1, b1, s1, t1, w2, b2, w3, b3, w4, b4, w5, b5, s2, t2, w6, b6)


def box_head_reference(x, params):
    """Pure-JAX f32 reference: full unfused 6-matmul chain (eval-mode BN)."""
    (w1, b1, s1, t1, w2, b2, w3, b3, w4, b4, w5, b5, s2, t2, w6, b6) = params
    h = x @ w1 + b1
    h = s1[None, :, None] * h + t1[None, :, None]
    h = h @ w2 + b2
    h = h @ w3 + b3
    h = h @ w4 + b4
    h = h @ w5 + b5
    h = s2[None, :, None] * h + t2[None, :, None]
    return h @ w6 + b6


if __name__ == "__main__":
    B, in_ins, in_feat = 2, 16, 16
    key = jax.random.PRNGKey(0)
    kx, kp = jax.random.split(key)
    x = jax.random.normal(kx, (B, in_ins, in_feat), jnp.float32)
    params = make_params(kp, in_feat, in_ins)

    out = jax.block_until_ready(box_head_forward(x, params))

    ref = box_head_reference(x, params)
    assert out.shape == (B, in_ins, 7)
    # bf16 matmuls (f32 accumulation + f32-folded middle layers) -> looser
    # tolerance than pure f32.
    assert jnp.allclose(out, ref, atol=5e-2, rtol=5e-2), "mismatch vs reference"
    print("KERNEL_OK")
</pallas_src>

<mosaic_0001>
module attributes {stable_mosaic.version = 11 : i64} {
  func.func @box_head_kernel(%arg0: i32, %arg1: memref<32x16xbf16, #tpu.memory_space<vmem>>, %arg2: memref<32x4xf32, #tpu.memory_space<vmem>>, %arg3: memref<16x32xbf16, #tpu.memory_space<vmem>>, %arg4: memref<1x32xf32, #tpu.memory_space<vmem>>, %arg5: memref<32x7xbf16, #tpu.memory_space<vmem>>, %arg6: memref<1x7xf32, #tpu.memory_space<vmem>>, %arg7: memref<7x7xbf16, #tpu.memory_space<vmem>>, %arg8: memref<7x1xf32, #tpu.memory_space<vmem>>, %arg9: memref<7x32xf32, #tpu.memory_space<vmem>>) attributes {dimension_semantics = [#tpu.dimension_semantics<parallel>], iteration_bounds = array<i64: 1>, scalar_prefetch = 0 : i64, scratch_operands = 0 : i64, tpu.core_type = #tpu.core_type<tc>, window_params = [{transform_indices = @transform_0, window_bounds = array<i64: 32, 16>}, {pipeline_mode = #tpu.pipeline_mode<synchronous>, transform_indices = @transform_1, window_bounds = array<i64: 32, 4>}, {pipeline_mode = #tpu.pipeline_mode<synchronous>, transform_indices = @transform_2, window_bounds = array<i64: 16, 32>}, {pipeline_mode = #tpu.pipeline_mode<synchronous>, transform_indices = @transform_3, window_bounds = array<i64: 1, 32>}, {pipeline_mode = #tpu.pipeline_mode<synchronous>, transform_indices = @transform_4, window_bounds = array<i64: 32, 7>}, {pipeline_mode = #tpu.pipeline_mode<synchronous>, transform_indices = @transform_5, window_bounds = array<i64: 1, 7>}, {pipeline_mode = #tpu.pipeline_mode<synchronous>, transform_indices = @transform_6, window_bounds = array<i64: 7, 7>}, {pipeline_mode = #tpu.pipeline_mode<synchronous>, transform_indices = @transform_7, window_bounds = array<i64: 7, 1>}, {transform_indices = @transform_8, window_bounds = array<i64: 7, 32>}]} {
    %c0 = arith.constant 0 : index
    %c0_0 = arith.constant 0 : index
    %0 = vector.load %arg2[%c0, %c0_0] : memref<32x4xf32, #tpu.memory_space<vmem>>, vector<32x4xf32>
    %1 = vector.extract_strided_slice %0 {offsets = [0, 0], sizes = [32, 1], strides = [1, 1]} : vector<32x4xf32> to vector<32x1xf32>
    %2 = vector.extract_strided_slice %0 {offsets = [0, 1], sizes = [32, 1], strides = [1, 1]} : vector<32x4xf32> to vector<32x1xf32>
    %3 = vector.extract_strided_slice %0 {offsets = [0, 2], sizes = [32, 1], strides = [1, 1]} : vector<32x4xf32> to vector<32x1xf32>
    %4 = vector.extract_strided_slice %0 {offsets = [0, 3], sizes = [32, 1], strides = [1, 1]} : vector<32x4xf32> to vector<32x1xf32>
    %c0_1 = arith.constant 0 : index
    %c0_2 = arith.constant 0 : index
    %5 = vector.load %arg1[%c0_1, %c0_2] : memref<32x16xbf16, #tpu.memory_space<vmem>>, vector<32x16xbf16>
    %c0_3 = arith.constant 0 : index
    %c0_4 = arith.constant 0 : index
    %6 = vector.load %arg3[%c0_3, %c0_4] : memref<16x32xbf16, #tpu.memory_space<vmem>>, vector<16x32xbf16>
    %cst = arith.constant dense<0.000000e+00> : vector<32x32xf32>
    %7 = tpu.matmul %5, %6, %cst {dimension_numbers = #tpu.dot_dimension_numbers<[1], [0], [0], [1], [0, 0, 1, 1], [], []>} : vector<32x16xbf16>, vector<16x32xbf16>, vector<32x32xf32> -> vector<32x32xf32>
    %c0_5 = arith.constant 0 : index
    %c0_6 = arith.constant 0 : index
    %8 = vector.load %arg4[%c0_5, %c0_6] : memref<1x32xf32, #tpu.memory_space<vmem>>, vector<1x32xf32>
    %9 = vector.broadcast %8 : vector<1x32xf32> to vector<32x32xf32>
    %10 = arith.addf %7, %9 : vector<32x32xf32>
    %11 = vector.broadcast %1 : vector<32x1xf32> to vector<32x32xf32>
    %12 = arith.mulf %11, %10 : vector<32x32xf32>
    %13 = vector.broadcast %2 : vector<32x1xf32> to vector<32x32xf32>
    %14 = arith.addf %12, %13 : vector<32x32xf32>
    %15 = arith.truncf %14 : vector<32x32xf32> to vector<32x32xbf16>
    %c0_7 = arith.constant 0 : index
    %c0_8 = arith.constant 0 : index
    %16 = vector.load %arg5[%c0_7, %c0_8] : memref<32x7xbf16, #tpu.memory_space<vmem>>, vector<32x7xbf16>
    %cst_9 = arith.constant dense<0.000000e+00> : vector<32x7xf32>
    %17 = tpu.matmul %15, %16, %cst_9 {dimension_numbers = #tpu.dot_dimension_numbers<[1], [0], [0], [1], [0, 0, 1, 1], [], []>} : vector<32x32xbf16>, vector<32x7xbf16>, vector<32x7xf32> -> vector<32x7xf32>
    %c0_10 = arith.constant 0 : index
    %c0_11 = arith.constant 0 : index
    %18 = vector.load %arg6[%c0_10, %c0_11] : memref<1x7xf32, #tpu.memory_space<vmem>>, vector<1x7xf32>
    %19 = vector.broadcast %18 : vector<1x7xf32> to vector<32x7xf32>
    %20 = arith.addf %17, %19 : vector<32x7xf32>
    %21 = vector.broadcast %3 : vector<32x1xf32> to vector<32x7xf32>
    %22 = arith.mulf %21, %20 : vector<32x7xf32>
    %23 = vector.broadcast %4 : vector<32x1xf32> to vector<32x7xf32>
    %24 = arith.addf %22, %23 : vector<32x7xf32>
    %25 = tpu.transpose %24, [1, 0] : vector<32x7xf32> -> vector<7x32xf32>
    %26 = arith.truncf %25 : vector<7x32xf32> to vector<7x32xbf16>
    %c0_12 = arith.constant 0 : index
    %c0_13 = arith.constant 0 : index
    %27 = vector.load %arg7[%c0_12, %c0_13] : memref<7x7xbf16, #tpu.memory_space<vmem>>, vector<7x7xbf16>
    %cst_14 = arith.constant dense<0.000000e+00> : vector<7x32xf32>
    %28 = tpu.matmul %27, %26, %cst_14 {dimension_numbers = #tpu.dot_dimension_numbers<[1], [0], [0], [1], [0, 0, 1, 1], [], []>} : vector<7x7xbf16>, vector<7x32xbf16>, vector<7x32xf32> -> vector<7x32xf32>
    %c0_15 = arith.constant 0 : index
    %c0_16 = arith.constant 0 : index
    %29 = vector.load %arg8[%c0_15, %c0_16] : memref<7x1xf32, #tpu.memory_space<vmem>>, vector<7x1xf32>
    %30 = vector.broadcast %29 : vector<7x1xf32> to vector<7x32xf32>
    %31 = arith.addf %28, %30 : vector<7x32xf32>
    %c0_17 = arith.constant 0 : index
    %c0_18 = arith.constant 0 : index
    %32 = vector.load %arg9[%c0_17, %c0_18] : memref<7x32xf32, #tpu.memory_space<vmem>>, vector<7x32xf32>
    tpu.vector_store %arg9[%c0_17, %c0_18], %31 {strides = array<i32>} : memref<7x32xf32, #tpu.memory_space<vmem>>, vector<7x32xf32>,
    return
  }
  func.func @transform_0(%arg0: i32) -> (i32, i32) {
    %c0_i32 = arith.constant 0 : i32
    %c0_i32_0 = arith.constant 0 : i32
    return %arg0, %c0_i32 : i32, i32
  }
  func.func @transform_1(%arg0: i32) -> (i32, i32) {
    %c0_i32 = arith.constant 0 : i32
    %c0_i32_0 = arith.constant 0 : i32
    %c0_i32_1 = arith.constant 0 : i32
    return %c0_i32, %c0_i32_0 : i32, i32
  }
  func.func @transform_2(%arg0: i32) -> (i32, i32) {
    %c0_i32 = arith.constant 0 : i32
    %c0_i32_0 = arith.constant 0 : i32
    %c0_i32_1 = arith.constant 0 : i32
    return %c0_i32, %c0_i32_0 : i32, i32
  }
  func.func @transform_3(%arg0: i32) -> (i32, i32) {
    %c0_i32 = arith.constant 0 : i32
    %c0_i32_0 = arith.constant 0 : i32
    %c0_i32_1 = arith.constant 0 : i32
    return %c0_i32, %c0_i32_0 : i32, i32
  }
  func.func @transform_4(%arg0: i32) -> (i32, i32) {
    %c0_i32 = arith.constant 0 : i32
    %c0_i32_0 = arith.constant 0 : i32
    %c0_i32_1 = arith.constant 0 : i32
    return %c0_i32, %c0_i32_0 : i32, i32
  }
  func.func @transform_5(%arg0: i32) -> (i32, i32) {
    %c0_i32 = arith.constant 0 : i32
    %c0_i32_0 = arith.constant 0 : i32
    %c0_i32_1 = arith.constant 0 : i32
    return %c0_i32, %c0_i32_0 : i32, i32
  }
  func.func @transform_6(%arg0: i32) -> (i32, i32) {
    %c0_i32 = arith.constant 0 : i32
    %c0_i32_0 = arith.constant 0 : i32
    %c0_i32_1 = arith.constant 0 : i32
    return %c0_i32, %c0_i32_0 : i32, i32
  }
  func.func @transform_7(%arg0: i32) -> (i32, i32) {
    %c0_i32 = arith.constant 0 : i32
    %c0_i32_0 = arith.constant 0 : i32
    %c0_i32_1 = arith.constant 0 : i32
    return %c0_i32, %c0_i32_0 : i32, i32
  }
  func.func @transform_8(%arg0: i32) -> (i32, i32) {
    %c0_i32 = arith.constant 0 : i32
    %c0_i32_0 = arith.constant 0 : i32
    return %c0_i32, %arg0 : i32, i32
  }
}

</mosaic_0001>

<bundles_post_ra>
// kernel: tpu_custom_call.1
= control target key start
LH: loop header
LB: loop body
LE: loop exit
PB: predicated region body
PF: predicated region fallthrough
CT: control target
= control target key end

     0   :  { %v380_v3 = vmov 0   ;;  %vm61_vm0 = vcmask 130048   ;;  %v381_v5 = vmov 1   ;;  %s481_s0 = inlined_call_operand.vmem [shape: bf16[32,16], index: 0, kind: input, shape index: {}]   ;;  %s482_s1 = inlined_call_operand.vmem [shape: f32[32,4], index: 1, kind: input, shape index: {}]   ;;  %s483_s2 = inlined_call_operand.vmem [shape: bf16[16,32], index: 2, kind: input, shape index: {}]   ;;  %s484_s3 = inlined_call_operand.vmem [shape: f32[1,32], index: 3, kind: input, shape index: {}]   ;;  %s485_s4 = inlined_call_operand.vmem [shape: bf16[32,7], index: 4, kind: input, shape index: {}]   ;;  %s486_s5 = inlined_call_operand.vmem [shape: f32[1,7], index: 5, kind: input, shape index: {}]   ;;  %s487_s6 = inlined_call_operand.vmem [shape: bf16[7,7], index: 6, kind: input, shape index: {}]   ;;  %s488_s7 = inlined_call_operand.vmem [shape: f32[7,1], index: 7, kind: input, shape index: {}]   ;;  %s489_s8 = inlined_call_operand.hbm [shape: f32[7,32], index: 8, kind: output, shape index: {}]  }
   0x1   :  { %v328_v0 = vld [vmem:[%s483_s2] sm:$0xff]  ;;  %340 = vset.pattern.permute.xlu0 %v380_v3  ;;  %341 = vset.pattern.permute.xlu1 %v380_v3  ;;  %v33_v4 = vld [vmem:[%s482_s1 + $0x10] sm:$0xff] }
   0x2   :  { %v31_v1 = vld [vmem:[%s482_s1] sm:$0xff]  ;;  %75 = vmatpush.bf16.msra.mxu0 %v328_v0  ;;  %99 = vperm.xlu1 %341, %v33_v4  }
   0x3   :  { %v326_v2 = vld [vmem:[%s481_s0] sm:$0xff]  ;;  %89 = vperm.xlu0 %340, %v31_v1   ;;  %342 = vset.pattern.permute.xlu2 %v381_v5 }
   0x4   :  { %13 = vsyncpa [#allocation3], 0  ;;  %112 = vperm.xlu2 %342, %v31_v1   ;;  %v32_v6 = vld [vmem:[%s482_s1 + $0x8] sm:$0xff]  ;;  %v34_v7 = vld [vmem:[%s482_s1 + $0x18] sm:$0xff]  ;;  %v382_v11 = vmov 3   ;;  %v383_v16 = vmov 2  }
   0x5   :  { %313 = vmatmul.msk.bf16.vlgmr.msra.gmra.mxu0 %vm61_vm0, %v326_v2  ;;  %v327_v8 = vld [vmem:[%s481_s0 + $0x8] sm:$0xff]  ;;  %v329_v10 = vld [vmem:[%s485_s4] sm:$0xff]  ;;  %vm153_vm1 = vcmask 261120   ;;  %vm263_vm2 = vcmask 1042432   ;;  %vm264_vm3 = vcmask 1043456   ;;  %v384_v2 = vmov 65535  }
   0x6   :  { %v330_v9 = vld [vmem:[%s485_s4 + $0x8] sm:$0xff]  ;;  %v352_v14 = vld [vmem:[%s484_s3] ss:$0 sm:$0xff]  ;;  %vm259_vm4 = vcmask 56320   ;;  %s385_s25 = smov [#allocation2]   ;;  %s292_s28 = sshll.u32 %s489_s8, 4  ;;  %s293_s28 = int_to_ptr.hbm [resolvable:$true] %s292_s28 }
   0x7   :  { %166 = vmatpush.bf16.msra.mxu1 %v330_v9  ;;  %331 = vmatpush.bf16.msra.mxu3 %v330_v9  ;;  %v353_v40 = vld [vmem:[%s486_s5] ss:$0 sm:$0xff]  ;;  %s290_s26 = sshll.u32 %s385_s25, 4  ;;  %vm283_vm5 = vcmask 260096   ;;  %s291_s26 = int_to_ptr.vmem [resolvable:$true] %s290_s26 }
   0x8   :  { %v252_v9 = vld [vmem:[%s487_s6] sm:$0xf] }
   0xa   :  { %104 = vperm.xlu1 %341, %v34_v7  }
   0xb   :  { %94 = vperm.xlu0 %340, %v32_v6   ;;  %167 = vmatpush.bf16.msra.mxu1 %v329_v10 }
   0xc   :  { %116 = vperm.xlu2 %342, %v32_v6   ;;  %332 = vmatpush.bf16.msra.mxu3 %v329_v10 }
  0x12   :  { %344 = vset.pattern.permute.xlu1 %v381_v5 }
  0x13   :  { %343 = vset.pattern.permute.xlu0 %v381_v5  ;;  %124 = vperm.xlu1 %344, %v34_v7  }
  0x14   :  { %120 = vperm.xlu0 %343, %v33_v4   ;;  %345 = vset.pattern.permute.xlu2 %v383_v16 }
  0x15   :  { %314 = vmatmul.msk.bf16.gmra.mxu0 %vm61_vm0, %v327_v8  ;;  %180 = vperm.xlu2 %345, %v31_v1  }
  0x1b   :  { %346 = vset.pattern.permute.xlu1 %v382_v11 }
  0x1c   :  { %347 = vset.pattern.permute.xlu0 %v382_v11  ;;  %200 = vperm.xlu1 %346, %v31_v1   ;;  %v253_v1 = vld [vmem:[%s488_s7] sm:$0x7f] }
  0x1d   :  { %204 = vperm.xlu0 %347, %v32_v6   ;;  %184 = vperm.xlu2 %345, %v32_v6  }
  0x24   :  { %348 = vset.pattern.permute.xlu1 %v383_v16 }
  0x25   :  { %188 = vperm.xlu1 %348, %v33_v4   ;;  %349 = vset.pattern.permute.xlu2 %v382_v11 }
  0x26   :  { %208 = vperm.xlu2 %349, %v33_v4   ;;  %v265_v4 = vsel %vm263_vm2, 4294967295, %v384_v2 }
  0x27   :  { %v266_v6 = vsel %vm264_vm3, %v265_v4, 0 }
  0x2d   :  { %192 = vperm.xlu1 %348, %v34_v7  }
  0x2e   :  { %212 = vperm.xlu2 %349, %v34_v7  }
  0x35   :  { %350 = vset.pattern.permute.xlu1 %v380_v3 }
  0x36   :  { %256 = vperm.xlu1 %350, %v253_v1  }
  0x5e   :  { %v113_v15 = vpop.permute.xlu2 %112 }
  0x66   :  { %v117_v24 = vpop.permute.xlu2 %116 }
  0x6f   :  { %v181_v41 = vpop.permute.xlu2 %180 }
  0x74   :  { %v100_v18 = vpop.permute.xlu1 %99 }
  0x75   :  { %v90_v13 = vpop.permute.xlu0 %89 }
  0x77   :  { %v185_v49 = vpop.permute.xlu2 %184 }
  0x7c   :  { %v105_v29 = vpop.permute.xlu1 %104 }
  0x7d   :  { %v95_v22 = vpop.permute.xlu0 %94 }
  0x80   :  { %v209_v56 = vpop.permute.xlu2 %208 }
  0x82   :  { %v77_v12 = vpop.f32.mrf.mxu0 }
  0x83   :  { %v78_v17 = vadd.f32 %v352_v14, %v77_v12 }
  0x85   :  { %v107_v20 = vmul.f32 %v90_v13, %v78_v17  ;;  %v125_v35 = vpop.permute.xlu1 %124 }
  0x86   :  { %v121_v34 = vpop.permute.xlu0 %120 }
  0x87   :  { %v127_v25 = vadd.f32 %v113_v15, %v107_v20 }
  0x88   :  { %v213_v63 = vpop.permute.xlu2 %212 }
  0x8a   :  { %v79_v19 = vpop.f32.mrf.mxu0 }
  0x8b   :  { %v80_v21 = vadd.f32 %v352_v14, %v79_v19 }
  0x8d   :  { %v108_v23 = vmul.f32 %v95_v22, %v80_v21 }
  0x8e   :  { %v201_v44 = vpop.permute.xlu1 %200 }
  0x8f   :  { %v128_v26 = vadd.f32 %v117_v24, %v108_v23  ;;  %v205_v50 = vpop.permute.xlu0 %204 }
  0x91   :  { %v131_v27 = vpack.c.bf16 %v128_v26, %v127_v25 }
  0x92   :  { %v82_v28 = vpop.f32.mrf.mxu0 }
  0x93   :  { %323 = vmatmul.msk.bf16.vlgmr.msra.gmra.mxu1 %vm153_vm1, %v131_v27  ;;  %v83_v30 = vadd.f32 %v352_v14, %v82_v28 }
  0x95   :  { %v109_v32 = vmul.f32 %v100_v18, %v83_v30 }
  0x97   :  { %v129_v37 = vadd.f32 %v121_v34, %v109_v32  ;;  %v189_v53 = vpop.permute.xlu1 %188 }
  0x9a   :  { %v84_v31 = vpop.f32.mrf.mxu0 }
  0x9b   :  { %v85_v33 = vadd.f32 %v352_v14, %v84_v31 }
  0x9d   :  { %v110_v36 = vmul.f32 %v105_v29, %v85_v33 }
  0x9f   :  { %v130_v38 = vadd.f32 %v125_v35, %v110_v36  ;;  %v193_v61 = vpop.permute.xlu1 %192 }
  0xa1   :  { %v132_v39 = vpack.c.bf16 %v130_v38, %v129_v37 }
  0xa3   :  { %324 = vmatmul.msk.bf16.vlgmr.msra.gmra.mxu3 %vm153_vm1, %v132_v39 }
 0x110   :  { %v169_v42 = vpop.f32.mrf.mxu1 }
 0x111   :  { %v170_v43 = vadd.f32 %v353_v40, %v169_v42 }
 0x113   :  { %v195_v45 = vmul.f32 %v181_v41, %v170_v43 }
 0x115   :  { %v215_v46 = vadd.f32 %v201_v44, %v195_v45 }
 0x117   :  { %219 = vxpose.xlu0.b32.start [1/4] (short) (narrow) %v215_v46, 8 }
 0x118   :  { %v171_v47 = vpop.f32.mrf.mxu1 }
 0x119   :  { %v172_v48 = vadd.f32 %v353_v40, %v171_v47 }
 0x11b   :  { %v196_v51 = vmul.f32 %v185_v49, %v172_v48 }
 0x11d   :  { %v216_v52 = vadd.f32 %v205_v50, %v196_v51 }
 0x11f   :  { %220 = vxpose.xlu0.b32.cont [2/4] (short) (narrow) %v216_v52, 8 }
 0x126   :  { %v174_v54 = vpop.f32.mrf.mxu3 }
 0x127   :  { %v175_v55 = vadd.f32 %v353_v40, %v174_v54 }
 0x129   :  { %v197_v57 = vmul.f32 %v189_v53, %v175_v55 }
 0x12b   :  { %v217_v58 = vadd.f32 %v209_v56, %v197_v57 }
 0x12d   :  { %221 = vxpose.xlu0.b32.cont [3/4] (short) (narrow) %v217_v58, 8 }
 0x12e   :  { %v176_v59 = vpop.f32.mrf.mxu3 }
 0x12f   :  { %v177_v60 = vadd.f32 %v353_v40, %v176_v59 }
 0x131   :  { %v198_v62 = vmul.f32 %v193_v61, %v177_v60 }
 0x133   :  { %v218_v0 = vadd.f32 %v213_v63, %v198_v62 }
 0x135   :  { %222 = vxpose.xlu0.b32.end [4/4] (short) (narrow) %v218_v0, 8 }
 0x19c   :  { %351 = vset.pattern.permute.xlu0 %v380_v3  ;;  %v257_v3 = vpop.permute.xlu1 %256 }
 0x1c1   :  { %v235_v5 = vpop.trf.xlu0 }
 0x1c2   :  { %v251_v7 = vpack.c.bf16 %v235_v5, %v235_v5 }
 0x1c4   :  { %v268_v8 = vand.u32 %v266_v6, %v251_v7 }
 0x1c6   :  { %277 = vmatpush.bf16.msra.mxu2 %v268_v8 }
 0x1c9   :  { %325 = vmatmul.msk.bf16.vlgmr.msra.gmra.mxu2 %vm259_vm4, %v252_v9 }
 0x24c   :  { %v279_v10 = vpop.f32.mrf.mxu2 }
 0x24d   :  { %v280_v11 = vadd.f32 %v279_v10, %v257_v3 }
 0x24f   :  { %284 = vst.msk [vmem:[#allocation2] sm:$0x7f] %vm283_vm5, %v280_v11 }
 0x250   :  { %295 = dma.vmem_to_hbm [thread:$0]  %s291_s26, 128, %s293_s28, [#allocation3]  }
 0x254   :  { %v281_v12 = vpop.f32.mrf.mxu2 }
 0x255   :  { %378 = dma.done.wait [#allocation3], 128  }
 0x256   :  { %379 = vsyncadd [#allocation3], 4294967168 }
 0x257   :  { %300 = vsyncpa [#allocation3], 1 }

</bundles_post_ra>
